<compile_context>
chip_gen: v5e
topology: v5e:2x2
jax: 0.10.0
libtpu: 0.0.40
codegen_flags: <defaults>
</compile_context>

<pallas_src>
import jax
import jax.numpy as jnp
from jax.experimental import pallas as pl
from jax.experimental.pallas import tpu as pltpu

LANE = 128


def _round_up(x, m):
    return ((x + m - 1) // m) * m


def _mlp_kernel(x_ref, w1_ref, b1_ref, w2_ref, b2_ref, w3_ref, b3_ref, out_ref):
    # x tile arrives as f32; cast to the weight dtype in-kernel (VPU cast is
    # free at this arithmetic intensity and avoids an extra HBM pass over x).
    x = x_ref[...].astype(w1_ref.dtype)

    h1 = jnp.dot(x, w1_ref[...], preferred_element_type=jnp.float32) + b1_ref[...]
    h1 = jnp.maximum(h1, 0.0)

    h2 = jnp.dot(h1.astype(w2_ref.dtype), w2_ref[...],
                 preferred_element_type=jnp.float32) + b2_ref[...]
    h2 = jnp.maximum(h2, 0.0)

    out = jnp.dot(h2.astype(w3_ref.dtype), w3_ref[...],
                  preferred_element_type=jnp.float32) + b3_ref[...]
    out_ref[...] = out.astype(out_ref.dtype)


def prepare_params(params, compute_dtype=jnp.float32):
    """One-time prep: transpose weights to (in, out), zero-pad *output* feature
    dims to 128 lanes, cast to compute dtype.

    fc1's input (K) dim is left at the raw flattened size so the wrapper never
    pads/copies x.  Zero padding keeps the math exact: padded hidden columns
    are relu(0 + 0) = 0, and padded logit lanes are sliced off in the wrapper.
    Returns (w1t, b1r, w2t, b2r, w3t, b3r):
      w1t: (d_in, 128), w2t: (128, 128), w3t: (128, 128) in compute_dtype
      b*r: (1, 128) float32
    """
    w1, b1, w2, b2, w3, b3 = params

    def prep_w(w, k_pad):
        wt = w.T                          # (in, out)
        in_f, out_f = wt.shape
        wt = jnp.pad(wt, ((0, k_pad - in_f), (0, LANE - out_f)))
        return wt.astype(compute_dtype)

    def prep_b(b):
        return jnp.pad(b, (0, LANE - b.shape[0]))[None, :].astype(jnp.float32)

    d_in = w1.shape[1]
    return (prep_w(w1, d_in), prep_b(b1),       # K of fc1 stays unpadded
            prep_w(w2, LANE), prep_b(b2),
            prep_w(w3, LANE), prep_b(b3))


def net_forward(x_nchw, prepared, *, tile_b_max=1024, out_dtype=jnp.float32):
    """x_nchw: (B, 1, H, W) float32.  Returns (B, 10) logits in out_dtype."""
    w1t, b1r, w2t, b2r, w3t, b3r = prepared
    d_in = w1t.shape[0]

    B = x_nchw.shape[0]
    x = x_nchw.reshape(B, -1)             # torch.flatten(x, 1): free reshape
    assert x.shape[1] == d_in, "prepared params do not match img_size"

    # Batch tiling.  No wrapper-side padding/copy of x: grid = cdiv(B, tile_b)
    # and the (possibly ragged) last tile is handled by Pallas -- rows are
    # independent and out-of-bounds output rows are never stored.
    sub = 16 if out_dtype == jnp.bfloat16 else 8
    if B <= sub:
        tile_b = B                         # single tile == full batch dim
    else:
        # Cap at ceil(B/2) (sublane-rounded) so the "parallel" batch axis has
        # >= 2 grid steps and both TensorCores engage on v7x.
        half = _round_up(pl.cdiv(B, 2), sub)
        tile_b = min(_round_up(tile_b_max, sub), half)
    grid = (pl.cdiv(B, tile_b),)

    const = lambda i: (0, 0)               # weights/biases: VMEM-resident
    out = pl.pallas_call(
        _mlp_kernel,
        out_shape=jax.ShapeDtypeStruct((B, LANE), out_dtype),
        grid=grid,
        in_specs=[
            pl.BlockSpec((tile_b, d_in), lambda i: (i, 0)),   # x: streamed
            pl.BlockSpec((d_in, LANE), const),                # w1
            pl.BlockSpec((1, LANE), const),                   # b1
            pl.BlockSpec((LANE, LANE), const),                # w2
            pl.BlockSpec((1, LANE), const),                   # b2
            pl.BlockSpec((LANE, LANE), const),                # w3
            pl.BlockSpec((1, LANE), const),                   # b3
        ],
        out_specs=pl.BlockSpec((tile_b, LANE), lambda i: (i, 0)),
        compiler_params=pltpu.CompilerParams(
            dimension_semantics=("parallel",),
            vmem_limit_bytes=32 * 1024 * 1024),
    )(x, w1t, b1r, w2t, b2r, w3t, b3r)

    return out[:, :10]


def init_params(img_size, key):
    """Deterministic init matching nn.Linear default (uniform +-1/sqrt(fan_in))."""
    d_in = 1 * img_size * img_size
    dims = [(120, d_in), (84, 120), (10, 84)]
    params = []
    for (out_f, in_f) in dims:
        key, kw, kb = jax.random.split(key, 3)
        bound = 1.0 / jnp.sqrt(in_f)
        w = jax.random.uniform(kw, (out_f, in_f), jnp.float32, -bound, bound)
        b = jax.random.uniform(kb, (out_f,), jnp.float32, -bound, bound)
        params.extend([w, b])
    return tuple(params)


if __name__ == "__main__":
    img_size = 16
    batch = 2

    key = jax.random.PRNGKey(0)
    key, kx = jax.random.split(key)
    x = jax.random.normal(kx, (batch, 1, img_size, img_size), jnp.float32)

    params = init_params(img_size, key)
    w1, b1, w2, b2, w3, b3 = params

    def ref_forward(xin):
        xf = xin.reshape(xin.shape[0], -1)
        h = jnp.maximum(xf @ w1.T + b1, 0.0)
        h = jnp.maximum(h @ w2.T + b2, 0.0)
        return h @ w3.T + b3

    # f32 path, single-tile grid: tight tolerance.
    prepared_f32 = prepare_params(params, jnp.float32)
    out_f32 = net_forward(x, prepared_f32)
    jax.block_until_ready(out_f32)
    assert out_f32.shape == (batch, 10)
    assert jnp.allclose(out_f32, ref_forward(x), atol=1e-4, rtol=1e-4)

    # Larger batch: exercises the multi-step "parallel" grid (>= 2 steps) and
    # the ragged last tile with no wrapper-side padding of x.
    batch2 = 20
    key, kx2 = jax.random.split(key)
    x2 = jax.random.normal(kx2, (batch2, 1, img_size, img_size), jnp.float32)
    out2 = net_forward(x2, prepared_f32)
    jax.block_until_ready(out2)
    assert out2.shape == (batch2, 10)
    assert jnp.allclose(out2, ref_forward(x2), atol=1e-4, rtol=1e-4)

    # bf16 weights + bf16 logit writeback (MXU-native, halved output traffic);
    # x stays f32 in HBM and is cast in-kernel.
    prepared_bf16 = prepare_params(params, jnp.bfloat16)
    out_bf16 = net_forward(x, prepared_bf16, out_dtype=jnp.bfloat16)
    jax.block_until_ready(out_bf16)
    assert out_bf16.shape == (batch, 10)
    assert jnp.allclose(out_bf16.astype(jnp.float32), ref_forward(x),
                        atol=5e-2, rtol=5e-2)

    print("KERNEL_OK")
</pallas_src>

<mosaic_0001>
module attributes {stable_mosaic.version = 11 : i64} {
  func.func @_mlp_kernel(%arg0: i32, %arg1: memref<2x256xf32, #tpu.memory_space<vmem>>, %arg2: memref<256x128xf32, #tpu.memory_space<vmem>>, %arg3: memref<1x128xf32, #tpu.memory_space<vmem>>, %arg4: memref<128x128xf32, #tpu.memory_space<vmem>>, %arg5: memref<1x128xf32, #tpu.memory_space<vmem>>, %arg6: memref<128x128xf32, #tpu.memory_space<vmem>>, %arg7: memref<1x128xf32, #tpu.memory_space<vmem>>, %arg8: memref<2x128xf32, #tpu.memory_space<vmem>>) attributes {dimension_semantics = [#tpu.dimension_semantics<parallel>], iteration_bounds = array<i64: 1>, scalar_prefetch = 0 : i64, scratch_operands = 0 : i64, tpu.core_type = #tpu.core_type<tc>, window_params = [{transform_indices = @transform_0, window_bounds = array<i64: 2, 256>}, {pipeline_mode = #tpu.pipeline_mode<synchronous>, transform_indices = @transform_1, window_bounds = array<i64: 256, 128>}, {pipeline_mode = #tpu.pipeline_mode<synchronous>, transform_indices = @transform_2, window_bounds = array<i64: 1, 128>}, {pipeline_mode = #tpu.pipeline_mode<synchronous>, transform_indices = @transform_3, window_bounds = array<i64: 128, 128>}, {pipeline_mode = #tpu.pipeline_mode<synchronous>, transform_indices = @transform_4, window_bounds = array<i64: 1, 128>}, {pipeline_mode = #tpu.pipeline_mode<synchronous>, transform_indices = @transform_5, window_bounds = array<i64: 128, 128>}, {pipeline_mode = #tpu.pipeline_mode<synchronous>, transform_indices = @transform_6, window_bounds = array<i64: 1, 128>}, {transform_indices = @transform_7, window_bounds = array<i64: 2, 128>}]} {
    %c0 = arith.constant 0 : index
    %c0_0 = arith.constant 0 : index
    %0 = vector.load %arg1[%c0, %c0_0] : memref<2x256xf32, #tpu.memory_space<vmem>>, vector<2x256xf32>
    %c0_1 = arith.constant 0 : index
    %c0_2 = arith.constant 0 : index
    %1 = vector.load %arg2[%c0_1, %c0_2] : memref<256x128xf32, #tpu.memory_space<vmem>>, vector<256x128xf32>
    %cst = arith.constant dense<0.000000e+00> : vector<2x128xf32>
    %2 = tpu.matmul %0, %1, %cst {dimension_numbers = #tpu.dot_dimension_numbers<[1], [0], [0], [1], [0, 0, 1, 1], [], []>} : vector<2x256xf32>, vector<256x128xf32>, vector<2x128xf32> -> vector<2x128xf32>
    %c0_3 = arith.constant 0 : index
    %c0_4 = arith.constant 0 : index
    %3 = vector.load %arg3[%c0_3, %c0_4] : memref<1x128xf32, #tpu.memory_space<vmem>>, vector<1x128xf32>
    %4 = vector.broadcast %3 : vector<1x128xf32> to vector<2x128xf32>
    %5 = arith.addf %2, %4 : vector<2x128xf32>
    %cst_5 = arith.constant 0.000000e+00 : f32
    %6 = vector.broadcast %cst_5 : f32 to vector<2x128xf32>
    %7 = arith.maximumf %5, %6 : vector<2x128xf32>
    %c0_6 = arith.constant 0 : index
    %c0_7 = arith.constant 0 : index
    %8 = vector.load %arg4[%c0_6, %c0_7] : memref<128x128xf32, #tpu.memory_space<vmem>>, vector<128x128xf32>
    %cst_8 = arith.constant dense<0.000000e+00> : vector<2x128xf32>
    %9 = tpu.matmul %7, %8, %cst_8 {dimension_numbers = #tpu.dot_dimension_numbers<[1], [0], [0], [1], [0, 0, 1, 1], [], []>} : vector<2x128xf32>, vector<128x128xf32>, vector<2x128xf32> -> vector<2x128xf32>
    %c0_9 = arith.constant 0 : index
    %c0_10 = arith.constant 0 : index
    %10 = vector.load %arg5[%c0_9, %c0_10] : memref<1x128xf32, #tpu.memory_space<vmem>>, vector<1x128xf32>
    %11 = vector.broadcast %10 : vector<1x128xf32> to vector<2x128xf32>
    %12 = arith.addf %9, %11 : vector<2x128xf32>
    %cst_11 = arith.constant 0.000000e+00 : f32
    %13 = vector.broadcast %cst_11 : f32 to vector<2x128xf32>
    %14 = arith.maximumf %12, %13 : vector<2x128xf32>
    %c0_12 = arith.constant 0 : index
    %c0_13 = arith.constant 0 : index
    %15 = vector.load %arg6[%c0_12, %c0_13] : memref<128x128xf32, #tpu.memory_space<vmem>>, vector<128x128xf32>
    %cst_14 = arith.constant dense<0.000000e+00> : vector<2x128xf32>
    %16 = tpu.matmul %14, %15, %cst_14 {dimension_numbers = #tpu.dot_dimension_numbers<[1], [0], [0], [1], [0, 0, 1, 1], [], []>} : vector<2x128xf32>, vector<128x128xf32>, vector<2x128xf32> -> vector<2x128xf32>
    %c0_15 = arith.constant 0 : index
    %c0_16 = arith.constant 0 : index
    %17 = vector.load %arg7[%c0_15, %c0_16] : memref<1x128xf32, #tpu.memory_space<vmem>>, vector<1x128xf32>
    %18 = vector.broadcast %17 : vector<1x128xf32> to vector<2x128xf32>
    %19 = arith.addf %16, %18 : vector<2x128xf32>
    %c0_17 = arith.constant 0 : index
    %c0_18 = arith.constant 0 : index
    %20 = vector.load %arg8[%c0_17, %c0_18] : memref<2x128xf32, #tpu.memory_space<vmem>>, vector<2x128xf32>
    tpu.vector_store %arg8[%c0_17, %c0_18], %19 {strides = array<i32>} : memref<2x128xf32, #tpu.memory_space<vmem>>, vector<2x128xf32>,
    return
  }
  func.func @transform_0(%arg0: i32) -> (i32, i32) {
    %c0_i32 = arith.constant 0 : i32
    %c0_i32_0 = arith.constant 0 : i32
    return %arg0, %c0_i32 : i32, i32
  }
  func.func @transform_1(%arg0: i32) -> (i32, i32) {
    %c0_i32 = arith.constant 0 : i32
    %c0_i32_0 = arith.constant 0 : i32
    %c0_i32_1 = arith.constant 0 : i32
    return %c0_i32, %c0_i32_0 : i32, i32
  }
  func.func @transform_2(%arg0: i32) -> (i32, i32) {
    %c0_i32 = arith.constant 0 : i32
    %c0_i32_0 = arith.constant 0 : i32
    %c0_i32_1 = arith.constant 0 : i32
    return %c0_i32, %c0_i32_0 : i32, i32
  }
  func.func @transform_3(%arg0: i32) -> (i32, i32) {
    %c0_i32 = arith.constant 0 : i32
    %c0_i32_0 = arith.constant 0 : i32
    %c0_i32_1 = arith.constant 0 : i32
    return %c0_i32, %c0_i32_0 : i32, i32
  }
  func.func @transform_4(%arg0: i32) -> (i32, i32) {
    %c0_i32 = arith.constant 0 : i32
    %c0_i32_0 = arith.constant 0 : i32
    %c0_i32_1 = arith.constant 0 : i32
    return %c0_i32, %c0_i32_0 : i32, i32
  }
  func.func @transform_5(%arg0: i32) -> (i32, i32) {
    %c0_i32 = arith.constant 0 : i32
    %c0_i32_0 = arith.constant 0 : i32
    %c0_i32_1 = arith.constant 0 : i32
    return %c0_i32, %c0_i32_0 : i32, i32
  }
  func.func @transform_6(%arg0: i32) -> (i32, i32) {
    %c0_i32 = arith.constant 0 : i32
    %c0_i32_0 = arith.constant 0 : i32
    %c0_i32_1 = arith.constant 0 : i32
    return %c0_i32, %c0_i32_0 : i32, i32
  }
  func.func @transform_7(%arg0: i32) -> (i32, i32) {
    %c0_i32 = arith.constant 0 : i32
    %c0_i32_0 = arith.constant 0 : i32
    return %arg0, %c0_i32 : i32, i32
  }
}

</mosaic_0001>

<bundles_post_ra>
// kernel: tpu_custom_call.1
= control target key start
LH: loop header
LB: loop body
LE: loop exit
PB: predicated region body
PF: predicated region fallthrough
CT: control target
= control target key end

     0   :  { %12 = vsyncpa [#allocation3], 0  ;;  %s482_s0 = inlined_call_operand.hbm [shape: f32[2,256], index: 0, kind: input, shape index: {}]   ;;  %s483_s1 = inlined_call_operand.hbm [shape: f32[256,128], index: 1, kind: input, shape index: {}]   ;;  %s484_s2 = inlined_call_operand.vmem [shape: f32[1,128], index: 2, kind: input, shape index: {}]   ;;  %s485_s3 = inlined_call_operand.hbm [shape: f32[128,128], index: 3, kind: input, shape index: {}]   ;;  %s486_s4 = inlined_call_operand.vmem [shape: f32[1,128], index: 4, kind: input, shape index: {}]   ;;  %s487_s5 = inlined_call_operand.hbm [shape: f32[128,128], index: 5, kind: input, shape index: {}]   ;;  %s488_s6 = inlined_call_operand.vmem [shape: f32[1,128], index: 6, kind: input, shape index: {}]   ;;  %s489_s7 = inlined_call_operand.hbm [shape: f32[2,128], index: 7, kind: output, shape index: {}]  }
   0x1   :  { %13 = vsyncpa [#allocation6], 0 }
   0x2   :  { %14 = vsyncpa [#allocation9], 0  ;;  %s31_s26 = sshll.u32 %s483_s1, 4  ;;  %s32_s26 = int_to_ptr.hbm [resolvable:$true] %s31_s26 }
   0x3   :  { %15 = vsyncpa [#allocation4], 0  ;;  %s411_s27 = smov [#allocation5]   ;;  %s21_s8 = sshll.u32 %s482_s0, 4  ;;  %s22_s8 = int_to_ptr.hbm [resolvable:$true] %s21_s8 }
   0x4   :  { %s33_s28 = sshll.u32 %s411_s27, 4  ;;  %s412_s9 = smov 128   ;;  %s34_s28 = int_to_ptr.vmem [resolvable:$true] %s33_s28 }
   0x5   :  { %s413_s10 = smov 8   ;;  %s414_s11 = smov [#allocation2]  }
   0x6   :  { %39 = dma.hbm_to_vmem [thread:$0]  %s32_s26, 4096, %s34_s28, [#allocation6], %s412_s9, %s412_s9, %s413_s10  }
   0x7   :  { %s23_s12 = sshll.u32 %s414_s11, 4  ;;  %s46_s15 = sshll.u32 %s485_s3, 4  ;;  %s24_s12 = int_to_ptr.vmem [resolvable:$true] %s23_s12  ;;  %s47_s15 = int_to_ptr.hbm [resolvable:$true] %s46_s15 }
   0x8   :  { %26 = dma.hbm_to_vmem [thread:$0]  %s22_s8, 64, %s24_s12, [#allocation3]  }
   0x9   :  { %s61_s17 = sshll.u32 %s487_s5, 4  ;;  %s415_s18 = smov [#allocation7]   ;;  %s62_s17 = int_to_ptr.hbm [resolvable:$true] %s61_s17 }
   0xa   :  { %s48_s19 = sshll.u32 %s415_s18, 4  ;;  %s416_s0 = smov [#allocation8]   ;;  %s49_s19 = int_to_ptr.vmem [resolvable:$true] %s48_s19 }
   0xb   :  { %54 = dma.hbm_to_vmem [thread:$0]  %s47_s15, 2048, %s49_s19, [#allocation6], %s412_s9, %s412_s9, %s413_s10  }
   0xc   :  { %s63_s20 = sshll.u32 %s416_s0, 4  ;;  %s64_s20 = int_to_ptr.vmem [resolvable:$true] %s63_s20 }
   0xd   :  { %69 = dma.hbm_to_vmem [thread:$0]  %s62_s17, 2048, %s64_s20, [#allocation9], %s412_s9, %s412_s9, %s413_s10  }
   0xe   :  { %403 = dma.done.wait [#allocation3], 64  }
   0xf   :  { %404 = vsyncadd [#allocation3], 4294967232 }
  0x10   :  { %405 = dma.done.wait [#allocation6], 6144  }
  0x11   :  { %406 = vsyncadd [#allocation6], 4294961152 }
  0x12   :  { %407 = dma.done.wait [#allocation9], 2048  }
  0x13   :  { %408 = vsyncadd [#allocation9], 4294965248  ;;  %v104_v0 = vld [vmem:[#allocation5 + $0x78] sm:$0xff]  ;;  %v103_v1 = vld [vmem:[#allocation5 + $0x70] sm:$0xff]  ;;  %s417_s24 = smov [#allocation10]   ;;  %s261_s28 = sshll.u32 %s489_s7, 4  ;;  %s262_s28 = int_to_ptr.hbm [resolvable:$true] %s261_s28 }
  0x14   :  { %v120_v2 = vld [vmem:[#allocation5 + $0xf8] sm:$0xff]  ;;  %131 = vmatpush.msra.mxu0 %v104_v0  ;;  %v119_v3 = vld [vmem:[#allocation5 + $0xf0] sm:$0xff]  ;;  %v102_v4 = vld [vmem:[#allocation5 + $0x68] sm:$0xff]  ;;  %s259_s25 = sshll.u32 %s417_s24, 4  ;;  %s260_s25 = int_to_ptr.vmem [resolvable:$true] %s259_s25 }
  0x15   :  { %151 = vmatpush.msra.mxu1 %v120_v2  ;;  %v118_v5 = vld [vmem:[#allocation5 + $0xe8] sm:$0xff]  ;;  %v101_v6 = vld [vmem:[#allocation5 + $0x60] sm:$0xff]  ;;  %v100_v8 = vld [vmem:[#allocation5 + $0x58] sm:$0xff] }
  0x16   :  { %132 = vmatpush.msra.mxu0 %v103_v1  ;;  %v117_v7 = vld [vmem:[#allocation5 + $0xe0] sm:$0xff]  ;;  %v116_v9 = vld [vmem:[#allocation5 + $0xd8] sm:$0xff]  ;;  %v99_v10 = vld [vmem:[#allocation5 + $0x50] sm:$0xff] }
  0x17   :  { %152 = vmatpush.msra.mxu1 %v119_v3  ;;  %v115_v11 = vld [vmem:[#allocation5 + $0xd0] sm:$0xff]  ;;  %v98_v12 = vld [vmem:[#allocation5 + $0x48] sm:$0xff]  ;;  %v88_v14 = vld [vmem:[#allocation2] sm:$0xf] }
  0x18   :  { %133 = vmatpush.msra.mxu0 %v102_v4  ;;  %v114_v13 = vld [vmem:[#allocation5 + $0xc8] sm:$0xff]  ;;  %126 = vst [vmem:[#allocation1] ss:$4 sm:$0xff] %v88_v14  ;;  %v187_v15 = vld [vmem:[#allocation7 + $0x78] sm:$0xff]  ;;  %v186_v16 = vld [vmem:[#allocation7 + $0x70] sm:$0xff] }
  0x19   :  { %153 = vmatpush.msra.mxu1 %v118_v5  ;;  %v97_v17 = vld [vmem:[#allocation5 + $0x40] sm:$0xff]  ;;  %192 = vmatpush.msra.mxu2 %v187_v15  ;;  %v185_v19 = vld [vmem:[#allocation7 + $0x68] sm:$0xff]  ;;  %v96_v20 = vld [vmem:[#allocation5 + $0x38] sm:$0xff] }
  0x1a   :  { %134 = vmatpush.msra.mxu0 %v101_v6  ;;  %v113_v18 = vld [vmem:[#allocation5 + $0xc0] sm:$0xff]  ;;  %v112_v21 = vld [vmem:[#allocation5 + $0xb8] sm:$0xff]  ;;  %v95_v23 = vld [vmem:[#allocation5 + $0x30] sm:$0xff] }
  0x1b   :  { %154 = vmatpush.msra.mxu1 %v117_v7  ;;  %193 = vmatpush.msra.mxu2 %v186_v16  ;;  %v184_v22 = vld [vmem:[#allocation7 + $0x60] sm:$0xff]  ;;  %v111_v24 = vld [vmem:[#allocation5 + $0xb0] sm:$0xff]  ;;  %v183_v25 = vld [vmem:[#allocation7 + $0x58] sm:$0xff] }
  0x1c   :  { %135 = vmatpush.msra.mxu0 %v100_v8  ;;  %v94_v26 = vld [vmem:[#allocation5 + $0x28] sm:$0xff]  ;;  %v182_v28 = vld [vmem:[#allocation7 + $0x50] sm:$0xff]  ;;  %v93_v29 = vld [vmem:[#allocation5 + $0x20] sm:$0xff] }
  0x1d   :  { %155 = vmatpush.msra.mxu1 %v116_v9  ;;  %194 = vmatpush.msra.mxu2 %v185_v19  ;;  %v110_v27 = vld [vmem:[#allocation5 + $0xa8] sm:$0xff]  ;;  %v109_v30 = vld [vmem:[#allocation5 + $0xa0] sm:$0xff]  ;;  %v92_v32 = vld [vmem:[#allocation5 + $0x18] sm:$0xff] }
  0x1e   :  { %136 = vmatpush.msra.mxu0 %v99_v10  ;;  %v181_v31 = vld [vmem:[#allocation7 + $0x48] sm:$0xff]  ;;  %v108_v33 = vld [vmem:[#allocation5 + $0x98] sm:$0xff]  ;;  %v180_v34 = vld [vmem:[#allocation7 + $0x40] sm:$0xff] }
  0x1f   :  { %156 = vmatpush.msra.mxu1 %v115_v11  ;;  %195 = vmatpush.msra.mxu2 %v184_v22  ;;  %v91_v35 = vld [vmem:[#allocation5 + $0x10] sm:$0xff]  ;;  %v179_v37 = vld [vmem:[#allocation7 + $0x38] sm:$0xff]  ;;  %v90_v38 = vld [vmem:[#allocation5 + $0x8] sm:$0xff] }
  0x20   :  { %137 = vmatpush.msra.mxu0 %v98_v12  ;;  %v107_v36 = vld [vmem:[#allocation5 + $0x90] sm:$0xff]  ;;  %v106_v39 = vld [vmem:[#allocation5 + $0x88] sm:$0xff]  ;;  %v89_v41 = vld [vmem:[#allocation5] sm:$0xff] }
  0x21   :  { %157 = vmatpush.msra.mxu1 %v114_v13  ;;  %196 = vmatpush.msra.mxu2 %v183_v25  ;;  %v178_v40 = vld [vmem:[#allocation7 + $0x30] sm:$0xff]  ;;  %v105_v42 = vld [vmem:[#allocation5 + $0x80] sm:$0xff]  ;;  %v177_v45 = vld [vmem:[#allocation7 + $0x28] sm:$0xff] }
  0x22   :  { %138 = vmatpush.msra.mxu0 %v97_v17  ;;  %v127_v43 = vld.sshfl [vmem:[#allocation1] sm:$0xff pattern:$0x73625140]  ;;  %v128_v44 = vld.sshfl [vmem:[#allocation1 + $0x8] sm:$0xff pattern:$0x73625140] }
  0x23   :  { %158 = vmatpush.msra.mxu1 %v113_v18  ;;  %197 = vmatpush.msra.mxu2 %v182_v28  ;;  %v176_v46 = vld [vmem:[#allocation7 + $0x20] sm:$0xff]  ;;  %v175_v47 = vld [vmem:[#allocation7 + $0x18] sm:$0xff]  ;;  %v174_v48 = vld [vmem:[#allocation7 + $0x10] sm:$0xff] }
  0x24   :  { %139 = vmatpush.msra.mxu0 %v96_v20  ;;  %v173_v49 = vld [vmem:[#allocation7 + $0x8] sm:$0xff]  ;;  %v172_v50 = vld [vmem:[#allocation7] sm:$0xff]  ;;  %v228_v51 = vld [vmem:[#allocation8 + $0x78] sm:$0xff] }
  0x25   :  { %159 = vmatpush.msra.mxu1 %v112_v21  ;;  %198 = vmatpush.msra.mxu2 %v181_v31  ;;  %v227_v52 = vld [vmem:[#allocation8 + $0x70] sm:$0xff]  ;;  %v226_v53 = vld [vmem:[#allocation8 + $0x68] sm:$0xff]  ;;  %v225_v54 = vld [vmem:[#allocation8 + $0x60] sm:$0xff] }
  0x26   :  { %140 = vmatpush.msra.mxu0 %v95_v23  ;;  %233 = vmatpush.msra.mxu3 %v228_v51  ;;  %v224_v55 = vld [vmem:[#allocation8 + $0x58] sm:$0xff]  ;;  %v223_v56 = vld [vmem:[#allocation8 + $0x50] sm:$0xff]  ;;  %v222_v57 = vld [vmem:[#allocation8 + $0x48] sm:$0xff] }
  0x27   :  { %160 = vmatpush.msra.mxu1 %v111_v24  ;;  %199 = vmatpush.msra.mxu2 %v180_v34  ;;  %v221_v58 = vld [vmem:[#allocation8 + $0x40] sm:$0xff]  ;;  %v220_v59 = vld [vmem:[#allocation8 + $0x38] sm:$0xff]  ;;  %v219_v60 = vld [vmem:[#allocation8 + $0x30] sm:$0xff] }
  0x28   :  { %141 = vmatpush.msra.mxu0 %v94_v26  ;;  %234 = vmatpush.msra.mxu3 %v227_v52  ;;  %v218_v61 = vld [vmem:[#allocation8 + $0x28] sm:$0xff]  ;;  %v217_v62 = vld [vmem:[#allocation8 + $0x20] sm:$0xff]  ;;  %v280_v63 = vld [vmem:[%s484_s2] ss:$0 sm:$0xff] }
  0x29   :  { %161 = vmatpush.msra.mxu1 %v110_v27  ;;  %200 = vmatpush.msra.mxu2 %v179_v37  ;;  %v216_v0 = vld [vmem:[#allocation8 + $0x18] sm:$0xff]  ;;  %v215_v6 = vld [vmem:[#allocation8 + $0x10] sm:$0xff]  ;;  %v214_v7 = vld [vmem:[#allocation8 + $0x8] sm:$0xff] }
  0x2a   :  { %142 = vmatpush.msra.mxu0 %v93_v29  ;;  %235 = vmatpush.msra.mxu3 %v226_v53  ;;  %v213_v8 = vld [vmem:[#allocation8] sm:$0xff]  ;;  %v281_v9 = vld [vmem:[%s486_s4] ss:$0 sm:$0xff] }
  0x2b   :  { %162 = vmatpush.msra.mxu1 %v109_v30  ;;  %201 = vmatpush.msra.mxu2 %v178_v40  ;;  %v282_v13 = vld [vmem:[%s488_s6] ss:$0 sm:$0xff] }
  0x2c   :  { %143 = vmatpush.msra.mxu0 %v92_v32  ;;  %236 = vmatpush.msra.mxu3 %v225_v54 }
  0x2d   :  { %163 = vmatpush.msra.mxu1 %v108_v33  ;;  %202 = vmatpush.msra.mxu2 %v177_v45 }
  0x2e   :  { %144 = vmatpush.msra.mxu0 %v91_v35  ;;  %237 = vmatpush.msra.mxu3 %v224_v55 }
  0x2f   :  { %164 = vmatpush.msra.mxu1 %v107_v36  ;;  %203 = vmatpush.msra.mxu2 %v176_v46 }
  0x30   :  { %145 = vmatpush.msra.mxu0 %v90_v38  ;;  %238 = vmatpush.msra.mxu3 %v223_v56 }
  0x31   :  { %165 = vmatpush.msra.mxu1 %v106_v39  ;;  %204 = vmatpush.msra.mxu2 %v175_v47 }
  0x32   :  { %146 = vmatpush.msra.mxu0 %v89_v41  ;;  %239 = vmatpush.msra.mxu3 %v222_v57 }
  0x33   :  { %166 = vmatpush.msra.mxu1 %v105_v42  ;;  %147 = vmatmul.f32.vlgmr.msra.gmra.mxu0 %v127_v43 }
  0x34   :  { %167 = vmatmul.f32.vlgmr.msra.gmra.mxu1 %v128_v44  ;;  %205 = vmatpush.msra.mxu2 %v174_v48 }
  0x35   :  { %240 = vmatpush.msra.mxu3 %v221_v58 }
  0x36   :  { %206 = vmatpush.msra.mxu2 %v173_v49 }
  0x37   :  { %241 = vmatpush.msra.mxu3 %v220_v59 }
  0x38   :  { %207 = vmatpush.msra.mxu2 %v172_v50 }
  0x39   :  { %242 = vmatpush.msra.mxu3 %v219_v60 }
  0x3b   :  { %243 = vmatpush.msra.mxu3 %v218_v61 }
  0x3d   :  { %244 = vmatpush.msra.mxu3 %v217_v62 }
  0x3f   :  { %245 = vmatpush.msra.mxu3 %v216_v0 }
  0x41   :  { %246 = vmatpush.msra.mxu3 %v215_v6 }
  0x43   :  { %247 = vmatpush.msra.mxu3 %v214_v7 }
  0x45   :  { %248 = vmatpush.msra.mxu3 %v213_v8 }
  0xb0   :  { %v148_v1 = vpop.f32.mrf.mxu0 }
  0xb1   :  { %v168_v2 = vpop.f32.mrf.mxu1  ;;  %v149_v3 = vadd.f32 %v280_v63, %v148_v1 }
  0xb3   :  { %v169_v4 = vadd.f32 %v168_v2, %v149_v3 }
  0xb5   :  { %v171_v5 = vmax.f32 %v169_v4, 0.0 }
  0xb7   :  { %208 = vmatmul.f32.vlgmr.msra.gmra.mxu2 %v171_v5 }
 0x13a   :  { %v209_v10 = vpop.f32.mrf.mxu2 }
 0x13b   :  { %v210_v11 = vadd.f32 %v281_v9, %v209_v10 }
 0x13d   :  { %v212_v12 = vmax.f32 %v210_v11, 0.0 }
 0x13f   :  { %249 = vmatmul.f32.vlgmr.msra.gmra.mxu3 %v212_v12 }
 0x1c2   :  { %v250_v14 = vpop.f32.mrf.mxu3 }
 0x1c3   :  { %v251_v15 = vadd.f32 %v282_v13, %v250_v14 }
 0x1c5   :  { %253 = vst [vmem:[#allocation10] sm:$0x3] %v251_v15 }
 0x1c6   :  { %264 = dma.vmem_to_hbm [thread:$0]  %s260_s25, 32, %s262_s28, [#allocation4]  }
 0x1c7   :  { %409 = dma.done.wait [#allocation4], 32  }
 0x1c8   :  { %410 = vsyncadd [#allocation4], 4294967264 }
 0x1c9   :  { %269 = vsyncpa [#allocation3], 1 }
 0x1ca   :  { %270 = vsyncpa [#allocation6], 1 }
 0x1cb   :  { %271 = vsyncpa [#allocation9], 1 }
 0x1cc   :  { %272 = vsyncpa [#allocation4], 1 }

</bundles_post_ra>
